<compile_context>
chip_gen: v6e
topology: v6e:2x2x1
jax: 0.10.0
libtpu: 0.0.40
codegen_flags: <defaults>
</compile_context>

<pallas_src>
import jax
import jax.numpy as jnp
from jax.experimental import pallas as pl
from jax.experimental.pallas import tpu as pltpu

_D_IN = 27
_D_H1 = 64
_D_H2 = 128
_D_OUT = 3
_LANE = 128                 # MXU-friendly padded width for w3 (compute only)
_DEFAULT_BATCH_TILE = 4096  # sweep 2048-8192; capped below for small B / v7x


def _round_up(n, m):
    return pl.cdiv(n, m) * m


def _mlp_kernel(x_ref, w1_ref, b1_ref, w2_ref, b2_ref, w3_ref, b3_ref, o_ref):
    """Fused 3-layer MLP forward for one batch tile (all operands VMEM-resident).

    f32 x is cast to bf16 on the VPU; bf16 matmul operands -> f32 MXU
    accumulation; bias + ReLU in f32 on the VPU; only 3 output columns stored.
    """
    x = x_ref[...].astype(jnp.bfloat16)                                 # (TB, 27)
    h1 = jnp.dot(x, w1_ref[...], preferred_element_type=jnp.float32)    # (TB, 64) f32
    h1 = jnp.maximum(h1 + b1_ref[...], 0.0)                             # ReLU
    h2 = jnp.dot(h1.astype(jnp.bfloat16), w2_ref[...],
                 preferred_element_type=jnp.float32)                    # (TB, 128) f32
    h2 = jnp.maximum(h2 + b2_ref[...], 0.0)                             # ReLU
    out = jnp.dot(h2.astype(jnp.bfloat16), w3_ref[...],
                  preferred_element_type=jnp.float32)                   # (TB, 128) f32
    out3 = out[:, :_D_OUT] + b3_ref[...]                                # (TB, 3)  f32
    o_ref[...] = out3.astype(o_ref.dtype)                               # 12 B/row store


def _prepare_params(params):
    """Cast weights to bf16; zero-pad w3 columns to 128 for the MXU (compute only)."""
    w1 = params["w1"].astype(jnp.bfloat16)                 # (27, 64)
    w2 = params["w2"].astype(jnp.bfloat16)                 # (64, 128)
    w3 = params["w3"]                                      # (128, 3)  f32
    w3p = jnp.zeros((w3.shape[0], _LANE), jnp.float32).at[:, :_D_OUT].set(w3)
    w3p = w3p.astype(jnp.bfloat16)                         # (128, 128) bf16, cols 3.. = 0
    return (w1, params["b1"].astype(jnp.float32),
            w2, params["b2"].astype(jnp.float32),
            w3p, params["b3"].astype(jnp.float32))         # b3 stays (1, 3)


def mlp_forward(x, params, *, batch_tile=None):
    """Run the fused MLP Pallas kernel.

    x: (B, 27) float array.
    params: dict with w1 (27,64), b1 (1,64), w2 (64,128), b2 (1,128),
            w3 (128,3), b3 (1,3) -- weights already in (in, out) layout.
    Returns (B, 3) float32.
    """
    B, d_in = x.shape
    assert d_in == _D_IN, f"expected {_D_IN} input features, got {d_in}"

    w1, b1, w2, b2, w3p, b3 = _prepare_params(params)

    # Batch tile: multiple of 16 rows, and capped so the grid has >= 2 steps
    # whenever B allows it (keeps both v7x TensorCores busy on the "parallel"
    # batch axis).  No host-side padding: Pallas masks the partial last block.
    if batch_tile is None:
        batch_tile = _DEFAULT_BATCH_TILE
    half = max(_round_up(pl.cdiv(B, 2), 16), 16)
    batch_tile = int(min(_round_up(batch_tile, 16), half))
    grid = (pl.cdiv(B, batch_tile),)

    def resident(shape):
        # Small weight/bias: one full-array block, same block index every step
        # -> fetched once and reused across all grid steps.
        return pl.BlockSpec(shape, lambda i: (0, 0))

    # Advisory cost model: real FLOPs / real HBM traffic (x read + out write + weights).
    flops = 2 * B * (_D_IN * _D_H1 + _D_H1 * _D_H2 + _D_H2 * _D_OUT)
    weight_bytes = 2 * (_D_IN * _D_H1 + _D_H1 * _D_H2 + _D_H2 * _LANE) \
        + 4 * (_D_H1 + _D_H2 + _D_OUT)
    bytes_accessed = B * 4 * (_D_IN + _D_OUT) + weight_bytes
    cost = pl.CostEstimate(flops=flops, transcendentals=0,
                           bytes_accessed=bytes_accessed)

    out = pl.pallas_call(
        _mlp_kernel,
        out_shape=jax.ShapeDtypeStruct((B, _D_OUT), jnp.float32),
        grid_spec=pltpu.PrefetchScalarGridSpec(
            num_scalar_prefetch=0,
            grid=grid,
            in_specs=[
                pl.BlockSpec((batch_tile, _D_IN), lambda i: (i, 0)),   # x tile (f32)
                resident(w1.shape), resident(b1.shape),
                resident(w2.shape), resident(b2.shape),
                resident(w3p.shape), resident(b3.shape),
            ],
            out_specs=pl.BlockSpec((batch_tile, _D_OUT), lambda i: (i, 0)),
        ),
        compiler_params=pltpu.CompilerParams(
            # Batch axis is embarrassingly parallel -> shard across TensorCores.
            dimension_semantics=("parallel",),
            # Raise v5e's 16 MiB default; still well under v7x's 64 MiB physical.
            vmem_limit_bytes=32 * 1024 * 1024,
        ),
        cost_estimate=cost,
    )(x, w1, b1, w2, b2, w3p, b3)

    return out


def init_params(key):
    """Deterministic init mirroring nn.Linear shapes (weights stored (in, out))."""
    k1, k2, k3, k4, k5, k6 = jax.random.split(key, 6)

    def linear_init(kw, kb, fan_in, fan_out):
        # PyTorch default: U(-1/sqrt(fan_in), 1/sqrt(fan_in))
        bound = 1.0 / jnp.sqrt(jnp.float32(fan_in))
        w = jax.random.uniform(kw, (fan_in, fan_out), jnp.float32, -bound, bound)
        b = jax.random.uniform(kb, (1, fan_out), jnp.float32, -bound, bound)
        return w, b

    w1, b1 = linear_init(k1, k2, _D_IN, _D_H1)
    w2, b2 = linear_init(k3, k4, _D_H1, _D_H2)
    w3, b3 = linear_init(k5, k6, _D_H2, _D_OUT)
    return {"w1": w1, "b1": b1, "w2": w2, "b2": b2, "w3": w3, "b3": b3}


def mlp_reference(x, params):
    """Pure-JAX reference with the same bf16-operand / f32-accumulate recipe."""
    bf16, f32 = jnp.bfloat16, jnp.float32
    h1 = jnp.maximum(
        jnp.dot(x.astype(bf16), params["w1"].astype(bf16),
                preferred_element_type=f32) + params["b1"], 0.0)
    h2 = jnp.maximum(
        jnp.dot(h1.astype(bf16), params["w2"].astype(bf16),
                preferred_element_type=f32) + params["b2"], 0.0)
    return jnp.dot(h2.astype(bf16), params["w3"].astype(bf16),
                   preferred_element_type=f32) + params["b3"]


if __name__ == "__main__":
    key = jax.random.PRNGKey(0)
    kp, kx1, kx2 = jax.random.split(key, 3)
    params = init_params(kp)

    # Tiny demo batch (input feature dim fixed at 27 by the module).
    x_small = jax.random.normal(kx1, (8, _D_IN), jnp.float32)
    out_small = jax.block_until_ready(mlp_forward(x_small, params))
    ref_small = mlp_reference(x_small, params)
    assert out_small.shape == (8, _D_OUT)
    assert jnp.allclose(out_small, ref_small, atol=2e-3, rtol=2e-3), (
        float(jnp.max(jnp.abs(out_small - ref_small))))

    # Ragged batch exercising the multi-step grid + masked partial last block.
    x_big = jax.random.normal(kx2, (200, _D_IN), jnp.float32)
    out_big = jax.block_until_ready(mlp_forward(x_big, params, batch_tile=64))
    ref_big = mlp_reference(x_big, params)
    assert out_big.shape == (200, _D_OUT)
    assert jnp.allclose(out_big, ref_big, atol=2e-3, rtol=2e-3), (
        float(jnp.max(jnp.abs(out_big - ref_big))))

    print("KERNEL_OK")
</pallas_src>

<mosaic_0001>
module attributes {stable_mosaic.version = 11 : i64} {
  func.func @_mlp_kernel(%arg0: i32, %arg1: memref<16x27xf32, #tpu.memory_space<vmem>>, %arg2: memref<27x64xbf16, #tpu.memory_space<vmem>>, %arg3: memref<1x64xf32, #tpu.memory_space<vmem>>, %arg4: memref<64x128xbf16, #tpu.memory_space<vmem>>, %arg5: memref<1x128xf32, #tpu.memory_space<vmem>>, %arg6: memref<128x128xbf16, #tpu.memory_space<vmem>>, %arg7: memref<1x3xf32, #tpu.memory_space<vmem>>, %arg8: memref<16x3xf32, #tpu.memory_space<vmem>>) attributes {dimension_semantics = [#tpu.dimension_semantics<parallel>], iteration_bounds = array<i64: 1>, scalar_prefetch = 0 : i64, scratch_operands = 0 : i64, tpu.core_type = #tpu.core_type<tc>, window_params = [{transform_indices = @transform_0, window_bounds = array<i64: 16, 27>}, {pipeline_mode = #tpu.pipeline_mode<synchronous>, transform_indices = @transform_1, window_bounds = array<i64: 27, 64>}, {pipeline_mode = #tpu.pipeline_mode<synchronous>, transform_indices = @transform_2, window_bounds = array<i64: 1, 64>}, {pipeline_mode = #tpu.pipeline_mode<synchronous>, transform_indices = @transform_3, window_bounds = array<i64: 64, 128>}, {pipeline_mode = #tpu.pipeline_mode<synchronous>, transform_indices = @transform_4, window_bounds = array<i64: 1, 128>}, {pipeline_mode = #tpu.pipeline_mode<synchronous>, transform_indices = @transform_5, window_bounds = array<i64: 128, 128>}, {pipeline_mode = #tpu.pipeline_mode<synchronous>, transform_indices = @transform_6, window_bounds = array<i64: 1, 3>}, {transform_indices = @transform_7, window_bounds = array<i64: 16, 3>}]} {
    %c0 = arith.constant 0 : index
    %c0_0 = arith.constant 0 : index
    %0 = vector.load %arg1[%c0, %c0_0] : memref<16x27xf32, #tpu.memory_space<vmem>>, vector<16x27xf32>
    %1 = arith.truncf %0 : vector<16x27xf32> to vector<16x27xbf16>
    %c0_1 = arith.constant 0 : index
    %c0_2 = arith.constant 0 : index
    %2 = vector.load %arg2[%c0_1, %c0_2] : memref<27x64xbf16, #tpu.memory_space<vmem>>, vector<27x64xbf16>
    %cst = arith.constant dense<0.000000e+00> : vector<16x64xf32>
    %3 = tpu.matmul %1, %2, %cst {dimension_numbers = #tpu.dot_dimension_numbers<[1], [0], [0], [1], [0, 0, 1, 1], [], []>} : vector<16x27xbf16>, vector<27x64xbf16>, vector<16x64xf32> -> vector<16x64xf32>
    %c0_3 = arith.constant 0 : index
    %c0_4 = arith.constant 0 : index
    %4 = vector.load %arg3[%c0_3, %c0_4] : memref<1x64xf32, #tpu.memory_space<vmem>>, vector<1x64xf32>
    %5 = vector.broadcast %4 : vector<1x64xf32> to vector<16x64xf32>
    %6 = arith.addf %3, %5 : vector<16x64xf32>
    %cst_5 = arith.constant 0.000000e+00 : f32
    %7 = vector.broadcast %cst_5 : f32 to vector<16x64xf32>
    %8 = arith.maximumf %6, %7 : vector<16x64xf32>
    %9 = arith.truncf %8 : vector<16x64xf32> to vector<16x64xbf16>
    %c0_6 = arith.constant 0 : index
    %c0_7 = arith.constant 0 : index
    %10 = vector.load %arg4[%c0_6, %c0_7] : memref<64x128xbf16, #tpu.memory_space<vmem>>, vector<64x128xbf16>
    %cst_8 = arith.constant dense<0.000000e+00> : vector<16x128xf32>
    %11 = tpu.matmul %9, %10, %cst_8 {dimension_numbers = #tpu.dot_dimension_numbers<[1], [0], [0], [1], [0, 0, 1, 1], [], []>} : vector<16x64xbf16>, vector<64x128xbf16>, vector<16x128xf32> -> vector<16x128xf32>
    %c0_9 = arith.constant 0 : index
    %c0_10 = arith.constant 0 : index
    %12 = vector.load %arg5[%c0_9, %c0_10] : memref<1x128xf32, #tpu.memory_space<vmem>>, vector<1x128xf32>
    %13 = vector.broadcast %12 : vector<1x128xf32> to vector<16x128xf32>
    %14 = arith.addf %11, %13 : vector<16x128xf32>
    %cst_11 = arith.constant 0.000000e+00 : f32
    %15 = vector.broadcast %cst_11 : f32 to vector<16x128xf32>
    %16 = arith.maximumf %14, %15 : vector<16x128xf32>
    %17 = arith.truncf %16 : vector<16x128xf32> to vector<16x128xbf16>
    %c0_12 = arith.constant 0 : index
    %c0_13 = arith.constant 0 : index
    %18 = vector.load %arg6[%c0_12, %c0_13] : memref<128x128xbf16, #tpu.memory_space<vmem>>, vector<128x128xbf16>
    %cst_14 = arith.constant dense<0.000000e+00> : vector<16x128xf32>
    %19 = tpu.matmul %17, %18, %cst_14 {dimension_numbers = #tpu.dot_dimension_numbers<[1], [0], [0], [1], [0, 0, 1, 1], [], []>} : vector<16x128xbf16>, vector<128x128xbf16>, vector<16x128xf32> -> vector<16x128xf32>
    %20 = vector.extract_strided_slice %19 {offsets = [0, 0], sizes = [16, 3], strides = [1, 1]} : vector<16x128xf32> to vector<16x3xf32>
    %c0_15 = arith.constant 0 : index
    %c0_16 = arith.constant 0 : index
    %21 = vector.load %arg7[%c0_15, %c0_16] : memref<1x3xf32, #tpu.memory_space<vmem>>, vector<1x3xf32>
    %22 = vector.broadcast %21 : vector<1x3xf32> to vector<16x3xf32>
    %23 = arith.addf %20, %22 : vector<16x3xf32>
    %c0_17 = arith.constant 0 : index
    %c0_18 = arith.constant 0 : index
    %24 = vector.load %arg8[%c0_17, %c0_18] : memref<16x3xf32, #tpu.memory_space<vmem>>, vector<16x3xf32>
    tpu.vector_store %arg8[%c0_17, %c0_18], %23 {strides = array<i32>} : memref<16x3xf32, #tpu.memory_space<vmem>>, vector<16x3xf32>,
    return
  }
  func.func @transform_0(%arg0: i32) -> (i32, i32) {
    %c0_i32 = arith.constant 0 : i32
    %c0_i32_0 = arith.constant 0 : i32
    return %arg0, %c0_i32 : i32, i32
  }
  func.func @transform_1(%arg0: i32) -> (i32, i32) {
    %c0_i32 = arith.constant 0 : i32
    %c0_i32_0 = arith.constant 0 : i32
    %c0_i32_1 = arith.constant 0 : i32
    return %c0_i32, %c0_i32_0 : i32, i32
  }
  func.func @transform_2(%arg0: i32) -> (i32, i32) {
    %c0_i32 = arith.constant 0 : i32
    %c0_i32_0 = arith.constant 0 : i32
    %c0_i32_1 = arith.constant 0 : i32
    return %c0_i32, %c0_i32_0 : i32, i32
  }
  func.func @transform_3(%arg0: i32) -> (i32, i32) {
    %c0_i32 = arith.constant 0 : i32
    %c0_i32_0 = arith.constant 0 : i32
    %c0_i32_1 = arith.constant 0 : i32
    return %c0_i32, %c0_i32_0 : i32, i32
  }
  func.func @transform_4(%arg0: i32) -> (i32, i32) {
    %c0_i32 = arith.constant 0 : i32
    %c0_i32_0 = arith.constant 0 : i32
    %c0_i32_1 = arith.constant 0 : i32
    return %c0_i32, %c0_i32_0 : i32, i32
  }
  func.func @transform_5(%arg0: i32) -> (i32, i32) {
    %c0_i32 = arith.constant 0 : i32
    %c0_i32_0 = arith.constant 0 : i32
    %c0_i32_1 = arith.constant 0 : i32
    return %c0_i32, %c0_i32_0 : i32, i32
  }
  func.func @transform_6(%arg0: i32) -> (i32, i32) {
    %c0_i32 = arith.constant 0 : i32
    %c0_i32_0 = arith.constant 0 : i32
    %c0_i32_1 = arith.constant 0 : i32
    return %c0_i32, %c0_i32_0 : i32, i32
  }
  func.func @transform_7(%arg0: i32) -> (i32, i32) {
    %c0_i32 = arith.constant 0 : i32
    %c0_i32_0 = arith.constant 0 : i32
    return %arg0, %c0_i32 : i32, i32
  }
}

</mosaic_0001>

<bundles_post_ra>
// kernel: tpu_custom_call.1
= control target key start
LH: loop header
LB: loop body
LE: loop exit
PB: predicated region body
PF: predicated region fallthrough
CT: control target
= control target key end

     0   :  { %12 = vsyncpa [#allocation3], 0  ;;  %s701_s0 = inlined_call_operand.hbm [shape: f32[8,27], index: 0, kind: input, shape index: {}]   ;;  %s702_s1 = inlined_call_operand.hbm [shape: bf16[27,64], index: 1, kind: input, shape index: {}]   ;;  %s703_s2 = inlined_call_operand.vmem [shape: f32[1,64], index: 2, kind: input, shape index: {}]   ;;  %s704_s3 = inlined_call_operand.hbm [shape: bf16[64,128], index: 3, kind: input, shape index: {}]   ;;  %s705_s4 = inlined_call_operand.vmem [shape: f32[1,128], index: 4, kind: input, shape index: {}]   ;;  %s706_s5 = inlined_call_operand.hbm [shape: bf16[128,128], index: 5, kind: input, shape index: {}]   ;;  %s707_s6 = inlined_call_operand.vmem [shape: f32[1,3], index: 6, kind: input, shape index: {}]   ;;  %s708_s7 = inlined_call_operand.vmem [shape: f32[8,3], index: 7, kind: output, shape index: {}]  }
   0x1   :  { %13 = vsyncpa [#allocation5], 0 }
   0x2   :  { %14 = vsyncpa [#allocation8], 0 }
   0x3   :  { %19 = vsyncadd [#allocation3], 128  ;;  %s597_s24 = smov [#allocation4]  }
   0x4   :  { %s32_s25 = sshll.u32 %s597_s24, 4  ;;  %s33_s25 = int_to_ptr.vmem [resolvable:$true] %s32_s25 }
   0x5   :  { %s519_s26 = scalar_lea.vmem %s33_s25, 256  ;;  %p524_p1 = scmp.lt.s32.totalorder %s33_s25, %s33_s25 }
   0x6   :  { %p520_p0 = scmp.ne.s32.totalorder %s33_s25, %s519_s26  ;;  %p525_p2 = scmp.lt.s32.totalorder %s519_s26, %s519_s26 }
   0x8   :  { %p526_p3 = por %p525_p2, %p524_p1 }
   0xa   :  { %p527_p4 = pnand %p526_p3, %p520_p0 }
   0xc   :  { %530 = shalt.err (!%p527_p4)
}
   0xd   :  { %s598_s27 = smov 64   ;;  %s599_s28 = smov 4  }
   0xe   :  { %38 = dma.hbm_to_vmem [thread:$0]  %s702_s1, 256, %s33_s25, [#allocation5], %s598_s27, %s598_s27, %s599_s28  }
   0xf   :  { %s600_s8 = smov [#allocation2]  }
  0x10   :  { %s20_s9 = sshll.u32 %s600_s8, 4  ;;  %s21_s9 = int_to_ptr.vmem [resolvable:$true] %s20_s9 }
  0x11   :  { %s539_s10 = scalar_lea.vmem %s21_s9, 128  ;;  %s543_s11 = scalar_lea.vmem %s21_s9, 256 }
  0x12   :  { %p540_p5 = scmp.ne.s32.totalorder %s21_s9, %s539_s10  ;;  %p544_p6 = scmp.lt.s32.totalorder %s21_s9, %s21_s9 }
  0x13   :  { %p545_p7 = scmp.lt.s32.totalorder %s543_s11, %s539_s10 }
  0x15   :  { %p546_p8 = por %p545_p7, %p544_p6 }
  0x17   :  { %p547_p9 = pnand %p546_p8, %p540_p5 }
  0x19   :  { %550 = shalt.err (!%p547_p9)
}
  0x1a   :  { %s601_s12 = smov 128   ;;  %s602_s13 = smov 8  }
  0x1b   :  { %26 = dma.hbm_to_vmem [thread:$0]  %s701_s0, 128, %s21_s9, [#allocation3], %s601_s12, %s601_s12, %s602_s13  }
  0x1c   :  { %s603_s16 = smov [#allocation6]   ;;  %s604_s1 = smov [#allocation7]  }
  0x1d   :  { %s46_s17 = sshll.u32 %s603_s16, 4  ;;  %s60_s18 = sshll.u32 %s604_s1, 4  ;;  %s47_s17 = int_to_ptr.vmem [resolvable:$true] %s46_s17  ;;  %s61_s18 = int_to_ptr.vmem [resolvable:$true] %s60_s18 }
  0x1e   :  { %s559_s19 = scalar_lea.vmem %s47_s17, 512  ;;  %p564_p11 = scmp.lt.s32.totalorder %s47_s17, %s47_s17 }
  0x1f   :  { %p560_p10 = scmp.ne.s32.totalorder %s47_s17, %s559_s19  ;;  %p565_p12 = scmp.lt.s32.totalorder %s559_s19, %s559_s19 }
  0x21   :  { %p566_p13 = por %p565_p12, %p564_p11 }
  0x23   :  { %p567_p0 = pnand %p566_p13, %p560_p10 }
  0x25   :  { %570 = shalt.err (!%p567_p0)
}
  0x26   :  { %52 = dma.hbm_to_vmem [thread:$0]  %s704_s3, 512, %s47_s17, [#allocation5], %s598_s27, %s598_s27, %s599_s28  }
  0x27   :  { %s579_s0 = scalar_lea.vmem %s61_s18, 1024  ;;  %p584_p2 = scmp.lt.s32.totalorder %s61_s18, %s61_s18 }
  0x28   :  { %p580_p1 = scmp.ne.s32.totalorder %s61_s18, %s579_s0  ;;  %p585_p3 = scmp.lt.s32.totalorder %s579_s0, %s579_s0 }
  0x2a   :  { %p586_p4 = por %p585_p3, %p584_p2 }
  0x2c   :  { %p587_p5 = pnand %p586_p4, %p580_p1 }
  0x2e   :  { %590 = shalt.err (!%p587_p5)
}
  0x2f   :  { %66 = dma.hbm_to_vmem [thread:$0]  %s706_s5, 1024, %s61_s18, [#allocation8], %s598_s27, %s598_s27, %s599_s28  }
  0x30   :  { %591 = dma.done.wait [#allocation3], 256  }
  0x31   :  { %592 = vsyncadd [#allocation3], 4294967040 }
  0x32   :  { %593 = dma.done.wait [#allocation5], 768  }
  0x33   :  { %594 = vsyncadd [#allocation5], 4294966528 }
  0x34   :  { %595 = dma.done.wait [#allocation8], 1024  }
  0x35   :  { %596 = vsyncadd [#allocation8], 4294966272  ;;  %vm111_vm0 = vcmask 1044480   ;;  %v605_v0 = vmov 0.0   ;;  %vm606_vm1 = vmmov 0   ;;  %vm112_vm2 = vcmask 1045504  }
  0x36   :  { %446 = vmatprep.subr.bf16.mxu1 %v605_v0  ;;  %466 = vmatprep.subr.bf16.mxu0 %v605_v0  ;;  %v607_v1 = vmov 65535   ;;  %v497_v4 = vld [vmem:[#allocation4 + $0x8] sm:$0x3f]   ;;  %v498_v6 = vld [vmem:[#allocation4] sm:$0xff]   ;;  %v82_v7 = vld [vmem:[#allocation2] sm:$0xff]  ;;  %vm107_vm3 = vcmask 220160  }
  0x37   :  { %450 = vmatprep.mubr.msk.bf16.mxu1 %vm606_vm1, %v605_v0  ;;  %482 = vmatprep.mubr.msk.bf16.mxu0 %vm606_vm1, %v605_v0  ;;  %v113_v2 = vsel %vm111_vm0, 4294967295, %v607_v1  ;;  %v83_v8 = vld [vmem:[#allocation2 + $0x8] sm:$0xff]  ;;  %v499_v9 = vld [vmem:[#allocation6 + $0x18] sm:$0xff]   ;;  %v500_v11 = vld [vmem:[#allocation6 + $0x10] sm:$0xff]   ;;  %vm201_vm4 = vcmask 523264   ;;  %vm363_vm5 = vcmask 23552  }
  0x38   :  { %v114_v3 = vsel %vm112_vm2, %v113_v2, 0  ;;  %v84_v10 = vpack.c.bf16 %v83_v8, %v82_v7  ;;  %v501_v12 = vld [vmem:[#allocation6 + $0x8] sm:$0xff]   ;;  %v502_v13 = vld [vmem:[#allocation6] sm:$0xff]   ;;  %v503_v14 = vld [vmem:[#allocation7 + $0x38] sm:$0xff]  }
  0x39   :  { %v116_v5 = vand.u32 %v497_v4, %v114_v3  ;;  %467 = vmatpush3.bf16.msra.mxu0 %v503_v14  ;;  %v504_v15 = vld [vmem:[#allocation7 + $0x30] sm:$0xff]   ;;  %v505_v16 = vld [vmem:[#allocation7 + $0x28] sm:$0xff]   ;;  %v506_v17 = vld [vmem:[#allocation7 + $0x20] sm:$0xff]  }
  0x3a   :  { %468 = vmatprep.subr.bf16.mxu0 %v605_v0  ;;  %v507_v18 = vld [vmem:[#allocation7 + $0x18] sm:$0xff]   ;;  %v410_v19 = vld [vmem:[%s703_s2] ss:$0 sm:$0xff]  ;;  %v508_v29 = vld [vmem:[#allocation7 + $0x10] sm:$0xff]  }
  0x3b   :  { %447 = vmatpush3.bf16.msra.mxu1 %v116_v5  ;;  %v509_v30 = vld [vmem:[#allocation7 + $0x8] sm:$0xff]   ;;  %v510_v31 = vld [vmem:[#allocation7] sm:$0xff]  }
  0x3c   :  { %448 = vmatprep.subr.bf16.mxu1 %v605_v0  ;;  %v414_v32 = vld [vmem:[%s705_s4] ss:$0 sm:$0xff] }
  0x3d   :  { %469 = vmatpush3.bf16.msra.mxu0 %v504_v15  ;;  %v428_v42 = vld [vmem:[%s707_s6] ss:$0 sm:$0xff] }
  0x3e   :  { %470 = vmatprep.subr.bf16.mxu0 %v605_v0 }
  0x3f   :  { %449 = vmatpush3.bf16.msra.mxu1 %v498_v6 }
  0x40   :  { %454 = vmatprep.subr.bf16.mxu1 %v605_v0 }
  0x41   :  { %471 = vmatpush3.bf16.msra.mxu0 %v505_v16 }
  0x42   :  { %451 = vmatmul.mubr.msk.bf16.vlgmr.msra.gmra.mxu1 %vm107_vm3, %v84_v10  ;;  %472 = vmatprep.subr.bf16.mxu0 %v605_v0 }
  0x43   :  { %455 = vmatpush3.bf16.msra.mxu1 %v499_v9  ;;  %462 = vmatprep.mubr.msk.bf16.mxu1 %vm606_vm1, %v605_v0 }
  0x44   :  { %456 = vmatprep.subr.bf16.mxu1 %v605_v0 }
  0x45   :  { %473 = vmatpush3.bf16.msra.mxu0 %v506_v17 }
  0x46   :  { %474 = vmatprep.subr.bf16.mxu0 %v605_v0 }
  0x47   :  { %457 = vmatpush3.bf16.msra.mxu1 %v500_v11 }
  0x48   :  { %458 = vmatprep.subr.bf16.mxu1 %v605_v0 }
  0x49   :  { %475 = vmatpush3.bf16.msra.mxu0 %v507_v18 }
  0x4a   :  { %476 = vmatprep.subr.bf16.mxu0 %v605_v0 }
  0x4b   :  { %459 = vmatpush3.bf16.msra.mxu1 %v501_v12 }
  0x4c   :  { %460 = vmatprep.subr.bf16.mxu1 %v605_v0 }
  0x4d   :  { %477 = vmatpush3.bf16.msra.mxu0 %v508_v29 }
  0x4e   :  { %478 = vmatprep.subr.bf16.mxu0 %v605_v0 }
  0x4f   :  { %461 = vmatpush3.bf16.msra.mxu1 %v502_v13 }
  0x51   :  { %479 = vmatpush3.bf16.msra.mxu0 %v509_v30 }
  0x52   :  { %480 = vmatprep.subr.bf16.mxu0 %v605_v0 }
  0x55   :  { %481 = vmatpush3.bf16.msra.mxu0 %v510_v31 }
 0x102   :  { %v152_v20 = vpop.f32.mrf.mxu1 }
 0x103   :  { %v153_v22 = vadd.f32 %v410_v19, %v152_v20 }
 0x104   :  { %v452_v21 = vpop.f32.mrf.mxu1 }
 0x105   :  { %v159_v26 = vmax.f32 %v153_v22, 0.0 }
 0x106   :  { %v155_v23 = vpop.f32.mrf.mxu1 }
 0x107   :  { %v156_v24 = vadd.f32 %v410_v19, %v155_v23 }
 0x108   :  { %v453_v25 = vpop.f32.mrf.mxu1 }
 0x109   :  { %v160_v27 = vmax.f32 %v156_v24, 0.0 }
 0x10b   :  { %v161_v28 = vpack.c.bf16 %v160_v27, %v159_v26 }
 0x10d   :  { %463 = vmatmul.mubr.msk.bf16.vlgmr.msra.gmra.mxu1 %vm201_vm4, %v161_v28 }
 0x1cd   :  { %v239_v33 = vpop.f32.mrf.mxu1 }
 0x1ce   :  { %v240_v35 = vadd.f32 %v414_v32, %v239_v33 }
 0x1cf   :  { %v464_v34 = vpop.f32.mrf.mxu1 }
 0x1d0   :  { %v246_v39 = vmax.f32 %v240_v35, 0.0 }
 0x1d1   :  { %v242_v36 = vpop.f32.mrf.mxu1 }
 0x1d2   :  { %v243_v37 = vadd.f32 %v414_v32, %v242_v36 }
 0x1d3   :  { %v465_v38 = vpop.f32.mrf.mxu1 }
 0x1d4   :  { %v247_v40 = vmax.f32 %v243_v37, 0.0 }
 0x1d6   :  { %v248_v41 = vpack.c.bf16 %v247_v40, %v246_v39 }
 0x1d8   :  { %483 = vmatmul.mubr.bf16.vlgmr.msra.gmra.mxu0 %v248_v41 }
 0x298   :  { %v347_v43 = vpop.f32.mrf.mxu0 }
 0x299   :  { %v361_v44 = vadd.f32 %v428_v42, %v347_v43 }
 0x29a   :  { %v484_v45 = vpop.f32.mrf.mxu0 }
 0x29b   :  { %364 = vst.msk [vmem:[#allocation9] sm:$0xff] %vm363_vm5, %v361_v44 }
 0x29c   :  { %v350_v46 = vpop.f32.mrf.mxu0 }
 0x29e   :  { %v485_v47 = vpop.f32.mrf.mxu0 }
 0x2a2   :  { %v396_v48 = vld [vmem:[#allocation9] sm:$0xff] }
 0x2a3   :  { %397 = vst [vmem:[%s708_s7] sm:$0xff] %v396_v48 }
 0x2a4   :  { %403 = vsyncpa [#allocation3], 1 }
 0x2a5   :  { %404 = vsyncpa [#allocation5], 1 }
 0x2a6   :  { %405 = vsyncpa [#allocation8], 1 }

</bundles_post_ra>
